<compile_context>
chip_gen: v6e
topology: v6e:2x2x1
jax: 0.10.0
libtpu: 0.0.40
codegen_flags: <defaults>
</compile_context>

<pallas_src>
from functools import partial

import jax
import jax.numpy as jnp
from jax import lax
from jax.experimental import pallas as pl
from jax.experimental.pallas import tpu as pltpu


def _mha_kernel(x_ref, wqkv_ref, bqkv_ref, wproj_ref, bproj_ref, o_ref, acc_ref,
                *, heads_per_step, head_dim):
    # x_ref:     (N, C)            bf16  (per-batch block)
    # wqkv_ref:  (NG, C, 3*G*D)    resident fused q|k|v weights (q pre-scaled)
    # bqkv_ref:  (NG, 1, 3*G*D)    resident fused biases
    # wproj_ref: (NG, G*D, C)      resident per-group rows of proj.weight^T
    # bproj_ref: (1, C)            resident proj bias
    # o_ref:     (N, C)            written once, at the last head group
    # acc_ref:   (N, C) f32        running output accumulator (persists over j)
    G, D = heads_per_step, head_dim
    GD = G * D
    j = pl.program_id(1)

    @pl.when(j == 0)
    def _init():
        acc_ref[...] = jnp.broadcast_to(
            bproj_ref[...].astype(jnp.float32), acc_ref.shape)

    x = x_ref[...]                                  # (N, C) bf16
    cdt = x.dtype

    # Fused QKV projection for this group of G heads: ONE wide MXU matmul.
    w = wqkv_ref[j]                                 # (C, 3*G*D)
    b = bqkv_ref[j]                                 # (1, 3*G*D)
    qkv = (jnp.dot(x, w, preferred_element_type=jnp.float32)
           + b.astype(jnp.float32)).astype(cdt)     # (N, 3*G*D) bf16

    ctx_parts = []
    for g in range(G):                              # static unroll over heads
        q = qkv[:, g * D:(g + 1) * D]               # (N, D), scale already folded
        k = qkv[:, GD + g * D:GD + (g + 1) * D]     # (N, D)
        v = qkv[:, 2 * GD + g * D:2 * GD + (g + 1) * D]

        # Scores: contract the head dim of both operands (no explicit k.T).
        s = lax.dot_general(q, k, (((1,), (1,)), ((), ())),
                            preferred_element_type=jnp.float32)      # (N, N) f32

        # Numerically stable softmax; normalization applied AFTER the PV
        # matmul (softmax is linear in its numerator -> exact).
        m = jnp.max(s, axis=-1, keepdims=True)
        e = jnp.exp(s - m)                                            # (N, N) f32
        l = jnp.sum(e, axis=-1, keepdims=True)                        # (N, 1) f32
        ctx = (jnp.dot(e.astype(cdt), v, preferred_element_type=jnp.float32)
               * pl.reciprocal(l, approx=True))                       # (N, D) f32
        ctx_parts.append(ctx.astype(cdt))

    ctx_cat = ctx_parts[0] if G == 1 else jnp.concatenate(ctx_parts, axis=-1)

    # Grouped output projection folded into the accumulator:
    #   out = b_proj + sum_j ctx_group_j @ Wproj[j]   (contraction depth G*D).
    acc_ref[...] += jnp.dot(ctx_cat, wproj_ref[j],
                            preferred_element_type=jnp.float32)

    @pl.when(j == pl.num_programs(1) - 1)
    def _store():
        o_ref[...] = acc_ref[...].astype(o_ref.dtype)


def mha_forward(x, params, *, num_heads, compute_dtype=jnp.bfloat16):
    """Pallas TPU implementation of MultiHeadAttention.forward
    (attn_mask=None, prompt=None, dropout = identity)."""
    B, N, C = x.shape
    H = num_heads
    D = C // H
    scale = D ** (-0.5)

    # Heads per grid step: largest divisor of H with G*D <= 256 (MXU width).
    G = 1
    for cand in range(H, 0, -1):
        if H % cand == 0 and cand * D <= 256:
            G = cand
            break
    NG = H // G
    GD = G * D

    # --- one-time parameter prep (plain JAX; hoistable) ----------------------
    # qkv.weight is (3C, C), row index = which*C + h*D + d.
    w = params["qkv_w"].reshape(3, NG, G, D, C)
    b = params["qkv_b"].reshape(3, NG, G, D)
    w = w.at[0].multiply(scale)                     # fold qk scale into Wq/bq
    b = b.at[0].multiply(scale)
    w_qkv = w.transpose(1, 4, 0, 2, 3).reshape(NG, C, 3 * GD)   # (NG, C, 3GD)
    b_qkv = b.transpose(1, 0, 2, 3).reshape(NG, 1, 3 * GD)      # (NG, 1, 3GD)
    # proj.weight is (C_out, C_in); out = ctx @ proj_w.T. Split the input
    # (head-feature) axis into per-group (G*D, C) blocks.
    w_proj = params["proj_w"].T.reshape(NG, GD, C)
    b_proj = params["proj_b"].reshape(1, C)

    xc = x.astype(compute_dtype)
    w_qkv = w_qkv.astype(compute_dtype)
    b_qkv = b_qkv.astype(compute_dtype)
    w_proj = w_proj.astype(compute_dtype)
    b_proj = b_proj.astype(compute_dtype)

    # --- VMEM budget (resident weights + per-step working set) ---------------
    isz = jnp.dtype(compute_dtype).itemsize
    weight_bytes = (3 * C * C + 3 * C + C * C + C) * isz
    est = (2 * weight_bytes                         # resident weights (x2 safety)
           + 2 * N * C * isz                        # x block (double-buffered)
           + 2 * N * C * x.dtype.itemsize           # output block
           + N * C * 4                              # f32 accumulator
           + N * 3 * GD * 4                         # fused qkv temp (f32)
           + 2 * N * N * 4                          # scores + exp (f32)
           + N * GD * 4)                            # ctx (f32)
    try:
        phys = int(getattr(pltpu.get_tpu_info(), "vmem_capacity_bytes",
                           64 * 1024 * 1024))
    except Exception:
        phys = 64 * 1024 * 1024                     # conservative (v7x) fallback
    vmem_limit = int(min(max(2 * est, 32 * 1024 * 1024), int(0.85 * phys)))

    kernel = partial(_mha_kernel, heads_per_step=G, head_dim=D)

    return pl.pallas_call(
        kernel,
        out_shape=jax.ShapeDtypeStruct((B, N, C), x.dtype),
        grid_spec=pltpu.PrefetchScalarGridSpec(
            num_scalar_prefetch=0,
            grid=(B, NG),                           # head-groups = reduction axis
            in_specs=[
                pl.BlockSpec((None, N, C), lambda bb, j: (bb, 0, 0)),      # x
                pl.BlockSpec((NG, C, 3 * GD), lambda bb, j: (0, 0, 0)),    # Wqkv
                pl.BlockSpec((NG, 1, 3 * GD), lambda bb, j: (0, 0, 0)),    # bqkv
                pl.BlockSpec((NG, GD, C), lambda bb, j: (0, 0, 0)),        # Wproj
                pl.BlockSpec((1, C), lambda bb, j: (0, 0)),                # bproj
            ],
            out_specs=pl.BlockSpec((None, N, C), lambda bb, j: (bb, 0, 0)),
            scratch_shapes=[pltpu.VMEM((N, C), jnp.float32)],
        ),
        compiler_params=pltpu.CompilerParams(
            dimension_semantics=("parallel", "arbitrary"),
            vmem_limit_bytes=vmem_limit,
        ),
    )(xc, w_qkv, b_qkv, w_proj, b_proj)


def mha_reference(x, params, *, num_heads):
    """Pure-JAX f32 reference mirroring the PyTorch forward (default args)."""
    B, N, C = x.shape
    H = num_heads
    D = C // H
    scale = D ** (-0.5)

    qkv = x @ params["qkv_w"].T + params["qkv_b"]               # (B, N, 3C)
    qkv = qkv.reshape(B, N, 3, H, D).transpose(2, 0, 3, 1, 4)
    q, k, v = qkv[0], qkv[1], qkv[2]                            # (B, H, N, D)

    attn = (q @ jnp.swapaxes(k, -2, -1)) * scale                # (B, H, N, N)
    attn = jax.nn.softmax(attn, axis=-1)
    out = (attn @ v).transpose(0, 2, 1, 3).reshape(B, N, C)
    return out @ params["proj_w"].T + params["proj_b"]


def _make_inputs(key, B, N, C):
    kx, k1, k2, k3, k4 = jax.random.split(key, 5)
    x = jax.random.normal(kx, (B, N, C), jnp.float32)
    params = {
        "qkv_w": jax.random.normal(k1, (3 * C, C), jnp.float32) * 0.05,
        "qkv_b": jax.random.normal(k2, (3 * C,), jnp.float32) * 0.05,
        "proj_w": jax.random.normal(k3, (C, C), jnp.float32) * 0.05,
        "proj_b": jax.random.normal(k4, (C,), jnp.float32) * 0.05,
    }
    return x, params


if __name__ == "__main__":
    key = jax.random.PRNGKey(0)
    # (B, N, C, H, tol): toy spec shape + a tiling-exercising shape
    # (D=64, G=4, NG=2) so head grouping / dynamic group indexing is covered.
    cases = [
        (2, 8, 32, 4, 3e-2),
        (2, 128, 512, 8, 6e-2),
    ]
    for idx, (B, N, C, H, tol) in enumerate(cases):
        key, sub = jax.random.split(key)
        x, params = _make_inputs(sub, B, N, C)
        out = jax.block_until_ready(mha_forward(x, params, num_heads=H))
        ref = mha_reference(x, params, num_heads=H)
        assert out.shape == (B, N, C)
        # bf16 MXU operands + approx softmax reciprocal vs f32 reference.
        err = float(jnp.max(jnp.abs(out - ref)))
        assert jnp.allclose(out, ref, atol=tol, rtol=tol), (
            f"case {idx}: mismatch vs JAX reference (max abs err {err:.4e})")
    print("KERNEL_OK")
</pallas_src>

<mosaic_0001>
module attributes {stable_mosaic.version = 11 : i64} {
  func.func @_mha_kernel(%arg0: i32, %arg1: i32, %arg2: memref<1x8x32xbf16, #tpu.memory_space<vmem>>, %arg3: memref<1x32x96xbf16, #tpu.memory_space<vmem>>, %arg4: memref<1x1x96xbf16, #tpu.memory_space<vmem>>, %arg5: memref<1x32x32xbf16, #tpu.memory_space<vmem>>, %arg6: memref<1x32xbf16, #tpu.memory_space<vmem>>, %arg7: memref<1x8x32xf32, #tpu.memory_space<vmem>>, %arg8: memref<8x32xf32, #tpu.memory_space<vmem>>) attributes {dimension_semantics = [#tpu.dimension_semantics<parallel>, #tpu.dimension_semantics<arbitrary>], iteration_bounds = array<i64: 2, 1>, scalar_prefetch = 0 : i64, scratch_operands = 1 : i64, tpu.core_type = #tpu.core_type<tc>, window_params = [{transform_indices = @transform_0, window_bounds = array<i64: 1, 8, 32>}, {pipeline_mode = #tpu.pipeline_mode<synchronous>, transform_indices = @transform_1, window_bounds = array<i64: 1, 32, 96>}, {pipeline_mode = #tpu.pipeline_mode<synchronous>, transform_indices = @transform_2, window_bounds = array<i64: 1, 1, 96>}, {pipeline_mode = #tpu.pipeline_mode<synchronous>, transform_indices = @transform_3, window_bounds = array<i64: 1, 32, 32>}, {pipeline_mode = #tpu.pipeline_mode<synchronous>, transform_indices = @transform_4, window_bounds = array<i64: 1, 32>}, {transform_indices = @transform_5, window_bounds = array<i64: 1, 8, 32>}]} {
    %c0_i32 = arith.constant 0 : i32
    %0 = arith.cmpi eq, %arg1, %c0_i32 : i32
    %1 = arith.extui %0 : i1 to i32
    %c0_i32_0 = arith.constant 0 : i32
    %2 = arith.cmpi ne, %1, %c0_i32_0 : i32
    scf.if %2 {
      %c0_32 = arith.constant 0 : index
      %c0_33 = arith.constant 0 : index
      %95 = vector.load %arg6[%c0_32, %c0_33] : memref<1x32xbf16, #tpu.memory_space<vmem>>, vector<1x32xbf16>
      %96 = arith.extf %95 : vector<1x32xbf16> to vector<1x32xf32>
      %97 = vector.shape_cast %96 : vector<1x32xf32> to vector<1x32xf32>
      %98 = vector.broadcast %97 : vector<1x32xf32> to vector<8x32xf32>
      %c0_34 = arith.constant 0 : index
      %c0_35 = arith.constant 0 : index
      %99 = vector.load %arg8[%c0_34, %c0_35] : memref<8x32xf32, #tpu.memory_space<vmem>>, vector<8x32xf32>
      tpu.vector_store %arg8[%c0_34, %c0_35], %98 {strides = array<i32>} : memref<8x32xf32, #tpu.memory_space<vmem>>, vector<8x32xf32>,
    } else {
    }
    %c0 = arith.constant 0 : index
    %c0_1 = arith.constant 0 : index
    %c0_2 = arith.constant 0 : index
    %3 = vector.load %arg2[%c0, %c0_1, %c0_2] : memref<1x8x32xbf16, #tpu.memory_space<vmem>>, vector<1x8x32xbf16>
    %4 = vector.shape_cast %3 : vector<1x8x32xbf16> to vector<8x32xbf16>
    %5 = arith.index_cast %arg1 : i32 to index
    %c0_3 = arith.constant 0 : index
    %c0_4 = arith.constant 0 : index
    %6 = vector.load %arg3[%5, %c0_3, %c0_4] : memref<1x32x96xbf16, #tpu.memory_space<vmem>>, vector<1x32x96xbf16>
    %7 = vector.shape_cast %6 : vector<1x32x96xbf16> to vector<32x96xbf16>
    %8 = arith.index_cast %arg1 : i32 to index
    %c0_5 = arith.constant 0 : index
    %c0_6 = arith.constant 0 : index
    %9 = vector.load %arg4[%8, %c0_5, %c0_6] : memref<1x1x96xbf16, #tpu.memory_space<vmem>>, vector<1x1x96xbf16>
    %10 = vector.shape_cast %9 : vector<1x1x96xbf16> to vector<1x96xbf16>
    %cst = arith.constant dense<0.000000e+00> : vector<8x96xf32>
    %11 = tpu.matmul %4, %7, %cst {dimension_numbers = #tpu.dot_dimension_numbers<[1], [0], [0], [1], [0, 0, 1, 1], [], []>} : vector<8x32xbf16>, vector<32x96xbf16>, vector<8x96xf32> -> vector<8x96xf32>
    %12 = arith.extf %10 : vector<1x96xbf16> to vector<1x96xf32>
    %13 = vector.broadcast %12 : vector<1x96xf32> to vector<8x96xf32>
    %14 = arith.addf %11, %13 : vector<8x96xf32>
    %15 = arith.truncf %14 : vector<8x96xf32> to vector<8x96xbf16>
    %16 = vector.extract_strided_slice %15 {offsets = [0, 0], sizes = [8, 8], strides = [1, 1]} : vector<8x96xbf16> to vector<8x8xbf16>
    %17 = vector.extract_strided_slice %15 {offsets = [0, 32], sizes = [8, 8], strides = [1, 1]} : vector<8x96xbf16> to vector<8x8xbf16>
    %18 = vector.extract_strided_slice %15 {offsets = [0, 64], sizes = [8, 8], strides = [1, 1]} : vector<8x96xbf16> to vector<8x8xbf16>
    %cst_7 = arith.constant dense<0.000000e+00> : vector<8x8xf32>
    %19 = tpu.matmul %16, %17, %cst_7 {dimension_numbers = #tpu.dot_dimension_numbers<[1], [1], [0], [0], [0, 0, 1, 0], [], []>} : vector<8x8xbf16>, vector<8x8xbf16>, vector<8x8xf32> -> vector<8x8xf32>
    %cst_8 = arith.constant dense<0xFF800000> : vector<8xf32>
    %20 = vector.multi_reduction <maximumf>, %19, %cst_8 [1] : vector<8x8xf32> to vector<8xf32>
    %21 = vector.shape_cast %20 : vector<8xf32> to vector<8x1xf32>
    %22 = vector.broadcast %21 : vector<8x1xf32> to vector<8x8xf32>
    %23 = arith.subf %19, %22 : vector<8x8xf32>
    %24 = math.exp %23 : vector<8x8xf32>
    %cst_9 = arith.constant dense<0.000000e+00> : vector<8xf32>
    %25 = vector.multi_reduction <add>, %24, %cst_9 [1] : vector<8x8xf32> to vector<8xf32>
    %26 = vector.shape_cast %25 : vector<8xf32> to vector<8x1xf32>
    %27 = arith.truncf %24 : vector<8x8xf32> to vector<8x8xbf16>
    %cst_10 = arith.constant dense<0.000000e+00> : vector<8x8xf32>
    %28 = tpu.matmul %27, %18, %cst_10 {dimension_numbers = #tpu.dot_dimension_numbers<[1], [0], [0], [1], [0, 0, 1, 1], [], []>} : vector<8x8xbf16>, vector<8x8xbf16>, vector<8x8xf32> -> vector<8x8xf32>
    %29 = tpu.reciprocal %26 {approx = true} : vector<8x1xf32> -> vector<8x1xf32>
    %30 = vector.broadcast %29 : vector<8x1xf32> to vector<8x8xf32>
    %31 = arith.mulf %28, %30 : vector<8x8xf32>
    %32 = arith.truncf %31 : vector<8x8xf32> to vector<8x8xbf16>
    %33 = vector.extract_strided_slice %15 {offsets = [0, 8], sizes = [8, 8], strides = [1, 1]} : vector<8x96xbf16> to vector<8x8xbf16>
    %34 = vector.extract_strided_slice %15 {offsets = [0, 40], sizes = [8, 8], strides = [1, 1]} : vector<8x96xbf16> to vector<8x8xbf16>
    %35 = vector.extract_strided_slice %15 {offsets = [0, 72], sizes = [8, 8], strides = [1, 1]} : vector<8x96xbf16> to vector<8x8xbf16>
    %cst_11 = arith.constant dense<0.000000e+00> : vector<8x8xf32>
    %36 = tpu.matmul %33, %34, %cst_11 {dimension_numbers = #tpu.dot_dimension_numbers<[1], [1], [0], [0], [0, 0, 1, 0], [], []>} : vector<8x8xbf16>, vector<8x8xbf16>, vector<8x8xf32> -> vector<8x8xf32>
    %cst_12 = arith.constant dense<0xFF800000> : vector<8xf32>
    %37 = vector.multi_reduction <maximumf>, %36, %cst_12 [1] : vector<8x8xf32> to vector<8xf32>
    %38 = vector.shape_cast %37 : vector<8xf32> to vector<8x1xf32>
    %39 = vector.broadcast %38 : vector<8x1xf32> to vector<8x8xf32>
    %40 = arith.subf %36, %39 : vector<8x8xf32>
    %41 = math.exp %40 : vector<8x8xf32>
    %cst_13 = arith.constant dense<0.000000e+00> : vector<8xf32>
    %42 = vector.multi_reduction <add>, %41, %cst_13 [1] : vector<8x8xf32> to vector<8xf32>
    %43 = vector.shape_cast %42 : vector<8xf32> to vector<8x1xf32>
    %44 = arith.truncf %41 : vector<8x8xf32> to vector<8x8xbf16>
    %cst_14 = arith.constant dense<0.000000e+00> : vector<8x8xf32>
    %45 = tpu.matmul %44, %35, %cst_14 {dimension_numbers = #tpu.dot_dimension_numbers<[1], [0], [0], [1], [0, 0, 1, 1], [], []>} : vector<8x8xbf16>, vector<8x8xbf16>, vector<8x8xf32> -> vector<8x8xf32>
    %46 = tpu.reciprocal %43 {approx = true} : vector<8x1xf32> -> vector<8x1xf32>
    %47 = vector.broadcast %46 : vector<8x1xf32> to vector<8x8xf32>
    %48 = arith.mulf %45, %47 : vector<8x8xf32>
    %49 = arith.truncf %48 : vector<8x8xf32> to vector<8x8xbf16>
    %50 = vector.extract_strided_slice %15 {offsets = [0, 16], sizes = [8, 8], strides = [1, 1]} : vector<8x96xbf16> to vector<8x8xbf16>
    %51 = vector.extract_strided_slice %15 {offsets = [0, 48], sizes = [8, 8], strides = [1, 1]} : vector<8x96xbf16> to vector<8x8xbf16>
    %52 = vector.extract_strided_slice %15 {offsets = [0, 80], sizes = [8, 8], strides = [1, 1]} : vector<8x96xbf16> to vector<8x8xbf16>
    %cst_15 = arith.constant dense<0.000000e+00> : vector<8x8xf32>
    %53 = tpu.matmul %50, %51, %cst_15 {dimension_numbers = #tpu.dot_dimension_numbers<[1], [1], [0], [0], [0, 0, 1, 0], [], []>} : vector<8x8xbf16>, vector<8x8xbf16>, vector<8x8xf32> -> vector<8x8xf32>
    %cst_16 = arith.constant dense<0xFF800000> : vector<8xf32>
    %54 = vector.multi_reduction <maximumf>, %53, %cst_16 [1] : vector<8x8xf32> to vector<8xf32>
    %55 = vector.shape_cast %54 : vector<8xf32> to vector<8x1xf32>
    %56 = vector.broadcast %55 : vector<8x1xf32> to vector<8x8xf32>
    %57 = arith.subf %53, %56 : vector<8x8xf32>
    %58 = math.exp %57 : vector<8x8xf32>
    %cst_17 = arith.constant dense<0.000000e+00> : vector<8xf32>
    %59 = vector.multi_reduction <add>, %58, %cst_17 [1] : vector<8x8xf32> to vector<8xf32>
    %60 = vector.shape_cast %59 : vector<8xf32> to vector<8x1xf32>
    %61 = arith.truncf %58 : vector<8x8xf32> to vector<8x8xbf16>
    %cst_18 = arith.constant dense<0.000000e+00> : vector<8x8xf32>
    %62 = tpu.matmul %61, %52, %cst_18 {dimension_numbers = #tpu.dot_dimension_numbers<[1], [0], [0], [1], [0, 0, 1, 1], [], []>} : vector<8x8xbf16>, vector<8x8xbf16>, vector<8x8xf32> -> vector<8x8xf32>
    %63 = tpu.reciprocal %60 {approx = true} : vector<8x1xf32> -> vector<8x1xf32>
    %64 = vector.broadcast %63 : vector<8x1xf32> to vector<8x8xf32>
    %65 = arith.mulf %62, %64 : vector<8x8xf32>
    %66 = arith.truncf %65 : vector<8x8xf32> to vector<8x8xbf16>
    %67 = vector.extract_strided_slice %15 {offsets = [0, 24], sizes = [8, 8], strides = [1, 1]} : vector<8x96xbf16> to vector<8x8xbf16>
    %68 = vector.extract_strided_slice %15 {offsets = [0, 56], sizes = [8, 8], strides = [1, 1]} : vector<8x96xbf16> to vector<8x8xbf16>
    %69 = vector.extract_strided_slice %15 {offsets = [0, 88], sizes = [8, 8], strides = [1, 1]} : vector<8x96xbf16> to vector<8x8xbf16>
    %cst_19 = arith.constant dense<0.000000e+00> : vector<8x8xf32>
    %70 = tpu.matmul %67, %68, %cst_19 {dimension_numbers = #tpu.dot_dimension_numbers<[1], [1], [0], [0], [0, 0, 1, 0], [], []>} : vector<8x8xbf16>, vector<8x8xbf16>, vector<8x8xf32> -> vector<8x8xf32>
    %cst_20 = arith.constant dense<0xFF800000> : vector<8xf32>
    %71 = vector.multi_reduction <maximumf>, %70, %cst_20 [1] : vector<8x8xf32> to vector<8xf32>
    %72 = vector.shape_cast %71 : vector<8xf32> to vector<8x1xf32>
    %73 = vector.broadcast %72 : vector<8x1xf32> to vector<8x8xf32>
    %74 = arith.subf %70, %73 : vector<8x8xf32>
    %75 = math.exp %74 : vector<8x8xf32>
    %cst_21 = arith.constant dense<0.000000e+00> : vector<8xf32>
    %76 = vector.multi_reduction <add>, %75, %cst_21 [1] : vector<8x8xf32> to vector<8xf32>
    %77 = vector.shape_cast %76 : vector<8xf32> to vector<8x1xf32>
    %78 = arith.truncf %75 : vector<8x8xf32> to vector<8x8xbf16>
    %cst_22 = arith.constant dense<0.000000e+00> : vector<8x8xf32>
    %79 = tpu.matmul %78, %69, %cst_22 {dimension_numbers = #tpu.dot_dimension_numbers<[1], [0], [0], [1], [0, 0, 1, 1], [], []>} : vector<8x8xbf16>, vector<8x8xbf16>, vector<8x8xf32> -> vector<8x8xf32>
    %80 = tpu.reciprocal %77 {approx = true} : vector<8x1xf32> -> vector<8x1xf32>
    %81 = vector.broadcast %80 : vector<8x1xf32> to vector<8x8xf32>
    %82 = arith.mulf %79, %81 : vector<8x8xf32>
    %83 = arith.truncf %82 : vector<8x8xf32> to vector<8x8xbf16>
    %84 = tpu.concatenate %32, %49, %66, %83 in 1 : vector<8x8xbf16>, vector<8x8xbf16>, vector<8x8xbf16>, vector<8x8xbf16> -> vector<8x32xbf16>
    %c0_23 = arith.constant 0 : index
    %c0_24 = arith.constant 0 : index
    %85 = vector.load %arg8[%c0_23, %c0_24] : memref<8x32xf32, #tpu.memory_space<vmem>>, vector<8x32xf32>
    %86 = arith.index_cast %arg1 : i32 to index
    %c0_25 = arith.constant 0 : index
    %c0_26 = arith.constant 0 : index
    %87 = vector.load %arg5[%86, %c0_25, %c0_26] : memref<1x32x32xbf16, #tpu.memory_space<vmem>>, vector<1x32x32xbf16>
    %88 = vector.shape_cast %87 : vector<1x32x32xbf16> to vector<32x32xbf16>
    %cst_27 = arith.constant dense<0.000000e+00> : vector<8x32xf32>
    %89 = tpu.matmul %84, %88, %cst_27 {dimension_numbers = #tpu.dot_dimension_numbers<[1], [0], [0], [1], [0, 0, 1, 1], [], []>} : vector<8x32xbf16>, vector<32x32xbf16>, vector<8x32xf32> -> vector<8x32xf32>
    %90 = arith.addf %85, %89 : vector<8x32xf32>
    %c0_28 = arith.constant 0 : index
    %c0_29 = arith.constant 0 : index
    %91 = vector.load %arg8[%c0_28, %c0_29] : memref<8x32xf32, #tpu.memory_space<vmem>>, vector<8x32xf32>
    tpu.vector_store %arg8[%c0_28, %c0_29], %90 {strides = array<i32>} : memref<8x32xf32, #tpu.memory_space<vmem>>, vector<8x32xf32>,
    %c0_i32_30 = arith.constant 0 : i32
    %92 = arith.cmpi eq, %arg1, %c0_i32_30 : i32
    %93 = arith.extui %92 : i1 to i32
    %c0_i32_31 = arith.constant 0 : i32
    %94 = arith.cmpi ne, %93, %c0_i32_31 : i32
    scf.if %94 {
      %c0_32 = arith.constant 0 : index
      %c0_33 = arith.constant 0 : index
      %95 = vector.load %arg8[%c0_32, %c0_33] : memref<8x32xf32, #tpu.memory_space<vmem>>, vector<8x32xf32>
      %c0_34 = arith.constant 0 : index
      %c0_35 = arith.constant 0 : index
      %c0_36 = arith.constant 0 : index
      %96 = vector.load %arg7[%c0_34, %c0_35, %c0_36] : memref<1x8x32xf32, #tpu.memory_space<vmem>>, vector<1x8x32xf32>
      %97 = vector.shape_cast %96 : vector<1x8x32xf32> to vector<8x32xf32>
      %98 = vector.shape_cast %95 : vector<8x32xf32> to vector<1x8x32xf32>
      tpu.vector_store %arg7[%c0_34, %c0_35, %c0_36], %98 {strides = array<i32>} : memref<1x8x32xf32, #tpu.memory_space<vmem>>, vector<1x8x32xf32>,
    } else {
    }
    return
  }
  func.func @transform_0(%arg0: i32, %arg1: i32) -> (i32, i32, i32) {
    %c0_i32 = arith.constant 0 : i32
    %c0_i32_0 = arith.constant 0 : i32
    %c0_i32_1 = arith.constant 0 : i32
    return %arg0, %c0_i32, %c0_i32_0 : i32, i32, i32
  }
  func.func @transform_1(%arg0: i32, %arg1: i32) -> (i32, i32, i32) {
    %c0_i32 = arith.constant 0 : i32
    %c0_i32_0 = arith.constant 0 : i32
    %c0_i32_1 = arith.constant 0 : i32
    %c0_i32_2 = arith.constant 0 : i32
    return %c0_i32, %c0_i32_0, %c0_i32_1 : i32, i32, i32
  }
  func.func @transform_2(%arg0: i32, %arg1: i32) -> (i32, i32, i32) {
    %c0_i32 = arith.constant 0 : i32
    %c0_i32_0 = arith.constant 0 : i32
    %c0_i32_1 = arith.constant 0 : i32
    %c0_i32_2 = arith.constant 0 : i32
    return %c0_i32, %c0_i32_0, %c0_i32_1 : i32, i32, i32
  }
  func.func @transform_3(%arg0: i32, %arg1: i32) -> (i32, i32, i32) {
    %c0_i32 = arith.constant 0 : i32
    %c0_i32_0 = arith.constant 0 : i32
    %c0_i32_1 = arith.constant 0 : i32
    %c0_i32_2 = arith.constant 0 : i32
    return %c0_i32, %c0_i32_0, %c0_i32_1 : i32, i32, i32
  }
  func.func @transform_4(%arg0: i32, %arg1: i32) -> (i32, i32) {
    %c0_i32 = arith.constant 0 : i32
    %c0_i32_0 = arith.constant 0 : i32
    %c0_i32_1 = arith.constant 0 : i32
    return %c0_i32, %c0_i32_0 : i32, i32
  }
  func.func @transform_5(%arg0: i32, %arg1: i32) -> (i32, i32, i32) {
    %c0_i32 = arith.constant 0 : i32
    %c0_i32_0 = arith.constant 0 : i32
    %c0_i32_1 = arith.constant 0 : i32
    return %arg0, %c0_i32, %c0_i32_0 : i32, i32, i32
  }
}

</mosaic_0001>

<bundles_post_ra>
// kernel: tpu_custom_call.1
= control target key start
LH: loop header
LB: loop body
LE: loop exit
PB: predicated region body
PF: predicated region fallthrough
CT: control target
= control target key end

     0   :  { %s1732_s0 = inlined_call_operand.hbm [shape: bf16[2,8,32], index: 0, kind: input, shape index: {}]   ;;  %s1733_s1 = inlined_call_operand.hbm [shape: bf16[1,32,96], index: 1, kind: input, shape index: {}]   ;;  %s1734_s2 = inlined_call_operand.vmem [shape: bf16[1,1,96], index: 2, kind: input, shape index: {}]   ;;  %s1735_s3 = inlined_call_operand.hbm [shape: bf16[1,32,32], index: 3, kind: input, shape index: {}]   ;;  %s1736_s4 = inlined_call_operand.vmem [shape: bf16[1,32], index: 4, kind: input, shape index: {}]   ;;  %s1737_s5 = inlined_call_operand.hbm [shape: f32[2,8,32], index: 5, kind: output, shape index: {}]  }
   0x1   :  { %1741 = sst [smem:[#allocation13_spill]] %s1733_s1 }
   0x2   :  { %10 = vsyncpa [#allocation4], 0 }
   0x3   :  { %12 = vsyncpa [#allocation4 + $0x1], 0 }
   0x4   :  { %13 = vsyncpa [#allocation7], 0 }
   0x5   :  { %14 = vsyncpa [#allocation5], 0 }
   0x6   :  { %16 = vsyncpa [#allocation5 + $0x1], 0  ;;  %s1469_s18 = smov 0   ;;  %s1471_s19 = smov 0  }
   0x7   :  { %s1473_s20 = smov 0   ;;  %s1475_s21 = smov 0  }
   0x8   :  { %s1477_s22 = smov 0   ;;  %s1479_s23 = smov 0  }
   0x9 LB: > { %s1013_s24 = sadd.s32 4294967295, %s1415_s23   ;;  %s1014_s25 = sadd.s32 4294967294, %s1415_s23   ;;  %s1415_s23 = sphi %s1479_s23, %s22_s23   ;;  %s1411_s22 = sphi %s1477_s22, %s1759_s22   ;;  %s1407_s21 = sphi %s1475_s21, %s1758_s21   ;;  %s1403_s20 = sphi %s1473_s20, %s1757_s20   ;;  %s1399_s19 = sphi %s1471_s19, %s1756_s19   ;;  %s1395_s18 = sphi %s1469_s18, %s1755_s18  }
   0xa   : > { %p54_p0 = scmp.ne.s32.totalorder %s1399_s19, %s1395_s18  ;;  %p1503_p1 = scmp.eq.s32.totalorder %s1013_s24, 0 }
   0xb   : > { %p1507_p2 = scmp.eq.s32.totalorder %s1013_s24, 1  ;;  %p168_p3 = scmp.eq.s32.totalorder %s1014_s25, 1 }
   0xc   : > { %s1742_s26 = scalar_select %p1503_p1, 1, 0 }
   0xd   : > { %p1513_p4 = por %p1503_p1, %p54_p0  ;;  %p1015_p5 = scmp.ge.s32.totalorder %s1415_s23, 1 }
   0xe   : > { %p1518_p6 = por %p168_p3, %p54_p0  ;;  %p175_p7 = scmp.lt.s32.totalorder %s1415_s23, 3 }
   0xf   : > { %s1744_s28 = scalar_select %p1513_p4, 1, 0 }
  0x10   : > { %s1745_s29 = scalar_select %p1518_p6, 1, 0 }
  0x11   : > { %p1523_p8 = pnand %p1015_p5, %p175_p7  ;;  %s1417_s6 = smov [#allocation6]  }
  0x12   : > { %s187_s7 = sshll.u32 %s1417_s6, 4  ;;  %s1418_s9 = smov [#allocation8]   ;;  %s188_s7 = int_to_ptr.vmem [resolvable:$true] %s187_s7 }
  0x13   : > { %p1142_p9 = pneg %p1523_p8  ;;  %s203_s10 = sshll.u32 %s1418_s9, 4  ;;  %s204_s10 = int_to_ptr.vmem [resolvable:$true] %s203_s10 }
  0x14   : > { %s1262_s11 = scalar_lea.vmem %s188_s7, 256  ;;  %p1270_p5 = scmp.lt.s32.totalorder %s188_s7, %s188_s7 }
  0x15   : > { %p1532_p11 = pnand %p1142_p9, %p1503_p1  ;;  %p1263_p13 = scmp.ne.s32.totalorder %s188_s7, %s1262_s11 }
  0x16   : > { %p1271_p7 = scmp.lt.s32.totalorder %s1262_s11, %s1262_s11 }
  0x17   : > { %p1253_p12 = pneg %p1532_p11 }
  0x18   : > { %p1272_p10 = por %p1271_p7, %p1270_p5 }
  0x19   : > { %p1265_p0 = pnand %p1263_p13, %p1253_p12 }
  0x1b   : > { %p1266_p3 = pneg %p1265_p0 }
  0x1d   : > { %p1273_p9 = pnand %p1272_p10, %p1266_p3 }
  0x1f   : > { %1276 = shalt.err (!%p1273_p9)
}
  0x20   : > { %s1419_s12 = smov 64   ;;  %s1420_s13 = smov 4  }
  0x21   : > { %s1748_s1 = sld [smem:[#allocation13_spill]]  ;;  %s1288_s16 = scalar_lea.vmem %s204_s10, 256 }
  0x22   : > { %p1289_p6 = scmp.ne.s32.totalorder %s204_s10, %s1288_s16  ;;  %p1296_p1 = scmp.lt.s32.totalorder %s204_s10, %s204_s10 }
  0x23   : > { %p1297_p4 = scmp.lt.s32.totalorder %s1288_s16, %s1288_s16 }
  0x24   : > { %p1291_p13 = pnand %p1289_p6, %p1253_p12 }
  0x25   : > { %p1298_p5 = por %p1297_p4, %p1296_p1 }
  0x26   : > { %p1292_p0 = pneg %p1291_p13 }
  0x27   : > { %1145 = dma.hbm_to_vmem [thread:$0]  (!%p1532_p11), %s1748_s1, 256, %s188_s7, [#allocation7], %s1419_s12, %s1419_s12, %s1420_s13  }
  0x28   : > { %p1299_p10 = pnand %p1298_p5, %p1292_p0 }
  0x2a   : > { %1302 = shalt.err (!%p1299_p10)
}
  0x2b   : > { %1148 = dma.hbm_to_vmem [thread:$0]  (!%p1532_p11), %s1735_s3, 256, %s204_s10, [#allocation7], %s1419_s12, %s1419_s12, %s1420_s13  }
  0x2c   : > { %s34_s25 = sadd.s32 1, %s1411_s22  ;;  %s41_s6 = sadd.s32 1, %s1403_s20 }
  0x2d   : > { %p36_p1 = scmp.ge.s32.totalorder %s34_s25, 2  ;;  %p48_p4 = scmp.ne.s32.totalorder %s1403_s20, %s1399_s19 }
  0x2e   : > { %p49_p6 = scmp.eq.s32.totalorder %s1415_s23, 0  ;;  %p1159_p12 = scmp.lt.s32.totalorder %s1415_s23, 2 }
  0x2f   : > { %s1761_s25 = smov (%p36_p1, %s34_s25), 0  ;;  %p1564_p7 = por %p1507_p2, %p48_p4 }
  0x30   : > { %p50_p3 = por %p49_p6, %p48_p4  ;;  %s38_s8 = ssub.s32 %s1411_s22, %s1761_s25 }
  0x31   : > { %s220_s9 = sand.u32 1, %s1403_s20   ;;  %p39_p9 = scmp.eq.s32.totalorder %s38_s8, 0 }
  0x32   : > { %s1019_s10 = sshll.u32 %s220_s9, 2  ;;  %s1020_s11 = sshll.u32 %s1411_s22, 6 }
  0x33   : > { %s1573_s12 = scalar_select %p39_p9, %s1403_s20, %s41_s6  }
  0x34   : > { %s229_s15 = scalar_lea.hbm %s1732_s0, %s1020_s11  ;;  %s224_s16 = scalar_lea.vmem [#allocation3], %s1019_s10 }
  0x35   : > { %s231_s17 = sshll.u32 %s224_s16, 4  ;;  %p1580_p11 = pnand %p1159_p12, %p50_p3  ;;  %s232_s17 = int_to_ptr.vmem [resolvable:$true] %s231_s17 }
  0x36   : > { %s221_s24 = scalar_lea.sflag [#allocation4], %s220_s9  ;;  %s1316_s8 = scalar_lea.vmem %s232_s17, 64 }
  0x37   : > { %p1305_p2 = pneg %p1580_p11  ;;  %p1317_p13 = scmp.ne.s32.totalorder %s232_s17, %s1316_s8 }
  0x38   : > { %s1421_s6 = smov [#allocation3]  }
  0x39   : > { %p1319_p0 = pnand %p1317_p13, %p1305_p2  ;;  %s1321_s1 = sshll.u32 %s1421_s6, 4  ;;  %s1322_s1 = int_to_ptr.vmem [resolvable:$false] %s1321_s1 }
  0x3a   : > { %s1323_s11 = scalar_lea.vmem %s1322_s1, 128  ;;  %p1324_p10 = scmp.lt.s32.totalorder %s232_s17, %s1322_s1 }
  0x3b   : > { %p1320_p5 = pneg %p1319_p0  ;;  %p1325_p1 = scmp.lt.s32.totalorder %s1323_s11, %s1316_s8 }
  0x3d   : > { %p1326_p4 = por %p1325_p1, %p1324_p10 }
  0x3f   : > { %p1327_p6 = pnand %p1326_p4, %p1320_p5 }
  0x41   : > { %1330 = shalt.err (!%p1327_p6)
}
  0x42   : > { %1152 = dma.hbm_to_vmem [thread:$0]  (!%p1580_p11), %s229_s15, 64, %s232_s17, %s221_s24  }
  0x43   : > { %240 = sbr.rel (%p1523_p8) target bundleno = 1340 (0x53c), region = 40  ;;  %s1591_s9 = sand.u32 (!%p1523_p8), 1, %s1399_s19  }
  0x44   : > { %s1022_s10 = sshll.u32 (!%p1523_p8), %s1591_s9, 2  ;;  %s243_s13 = scalar_lea.sflag (!%p1523_p8), [#allocation4], %s1591_s9 }
  0x45   : > { %s246_s14 = scalar_lea.vmem (!%p1523_p8), [#allocation3], %s1022_s10  ;;  %p1751_p12 = scmp.ne.s32.totalorder (!%p1523_p8), %s1744_s28, 0 }
  0x48   : > { %1382 = dma.done.wait (%p1751_p12), %s243_s13, 64  }
  0x49   : > { %1384 = vsyncadd (%p1751_p12), %s243_s13, 4294967232  ;;  %p1752_p3 = scmp.ne.s32.totalorder %s1742_s26, 0 }
  0x4b   : > { %1386 = dma.done.wait (%p1752_p3), [#allocation7], 512  }
  0x4c   : > { %1388 = vsyncadd (%p1752_p3), [#allocation7], 4294966784  ;;  %v1422_v0 = vmov 0.0   ;;  %vm1423_vm0 = vmmov 0   ;;  %v288_v1 = vlaneseq  ;;  %v1231_v3 = vld [vmem:[#allocation6 + $0x8] sm:$0xff]   ;;  %v1232_v4 = vld [vmem:[#allocation6] sm:$0xff]  }
  0x4d   : > { %1066 = vmatprep.subr.bf16.mxu0 %v1422_v0  ;;  %1070 = vmatprep.mubr.msk.bf16.mxu0 %vm1423_vm0, %v1422_v0  ;;  %v286_v5 = vld [vmem:[%s1736_s4] sm:$0x1]  ;;  %vm292_vm1 = vcmask 261120   ;;  %v294_v9 = vld [vmem:[%s246_s14] sm:$0xf]  ;;  %s1424_s15 = smov 120  }
  0x4e   : > { %1074 = vmatprep.subr.bf16.mxu1 %v1422_v0  ;;  %1076 = vmatprep.mubr.msk.bf16.mxu1 %vm1423_vm0, %v1422_v0  ;;  %v289_v2 = vshrl.u32 %v288_v1, 7  ;;  %v287_v7 = vunpack.c.l.bf16 %v286_v5  ;;  %v303_v10 = vld [vmem:[%s1734_s2] sm:$0x1]  ;;  %s1425_s16 = smov 96   ;;  %s1426_s17 = smov 80   ;;  %vm369_vm2 = vcmask 64512  }
  0x4f   : > { %1067 = vmatpush3.bf16.msra.mxu0 %v1231_v3  ;;  %v304_v11 = vunpack.c.l.bf16 %v303_v10  ;;  %s1427_s27 = smov 88   ;;  %s1428_s24 = smov 72   ;;  %vm431_vm3 = vcmask 1043456   ;;  %vm823_vm4 = vcmask 130048   ;;  %vm826_vm5 = vcmask 195584  }
  0x50   : > { %v290_v6 = vsub.s32 0, %v289_v2  ;;  %1068 = vmatprep.subr.bf16.mxu0 %v1422_v0  ;;  %s1429_s8 = smov 112   ;;  %s1430_s6 = smov 104  }
  0x51   : > { %s1431_s11 = smov 56   ;;  %s1432_s10 = smov 64  }
  0x52   : > { %v291_v8 = vrot.slane %v287_v7, %v290_v6  ;;  %v308_v12 = vrot.slane %v304_v11, %v290_v6  ;;  %s1433_s13 = smov 40   ;;  %s1434_s14 = smov 48  }
  0x53   : > { %1069 = vmatpush3.bf16.msra.mxu0 %v1232_v4  ;;  %s1435_s1 = smov 8   ;;  %s1436_s26 = smov 16  }
  0x54   : > { %293 = vst.msk [vmem:[#allocation2] sm:$0xff] %vm292_vm1, %v291_v8  ;;  %1080 = vmatprep.subr.bf16.mxu0 %v1422_v0  ;;  %s1437_s28 = smov 24   ;;  %s1025_s30 = sshll.u32 %s1591_s9, 3 }
  0x56   : > { %1071 = vmatmul.mubr.msk.bf16.vlgmr.msra.gmra.mxu0 %vm292_vm1, %v294_v9 }
  0x57   : > { %1082 = vmatprep.mubr.msk.bf16.mxu0 %vm1423_vm0, %v1422_v0 }
 0x116   : > { %v359_v13 = vpop.f32.mrf.mxu0 }
 0x117   : > { %v360_v14 = vadd.f32 %v359_v13, %v308_v12 }
 0x118   : > { %v1072_v15 = vpop.f32.mrf.mxu0 }
 0x119   : > { %v1621_v16 = vpack.c.bf16 %v360_v14, %v360_v14 }
 0x11a   : > { %v362_v17 = vpop.f32.mrf.mxu0 }
 0x11b   : > { %478 = vrot.lane.b32.xlu1 %v1621_v16, %s1424_s15  ;;  %367 = vrot.lane.b32.xlu0 %v1621_v16, %s1425_s16  ;;  %s1041_s15 = sshll.u32 %s1407_s21, 7  ;;  %s280_s16 = scalar_lea.vmem [#allocation9], %s1025_s30 }
 0x11c   : > { %v1073_v18 = vpop.f32.mrf.mxu0 }
 0x11f   : > { %591 = vrot.lane.b32.xlu1 %v1621_v16, %s1426_s17  ;;  %480 = vrot.lane.b32.xlu0 %v1621_v16, %s1427_s27  ;;  %s911_s17 = sshll.u32 %s280_s16, 4  ;;  %s912_s17 = int_to_ptr.vmem [resolvable:$true] %s911_s17 }
 0x123   : > { %702 = vrot.lane.b32.xlu1 %v1621_v16, %s1428_s24  ;;  %589 = vrot.lane.b32.xlu0 %v1621_v16, %s1429_s8  ;;  %s1689_s8 = scalar_lea.hbm %s1737_s5, %s1041_s15 }
 0x127   : > { %700 = vrot.lane.b32.xlu0 %v1621_v16, %s1430_s6  ;;  %s898_s6 = scalar_lea.sflag [#allocation5], %s1591_s9 }
 0x18d   : > { %v368_v19 = vpop.permute.xlu0 %367  ;;  %v479_v22 = vpop.permute.xlu1 %478 }
 0x18e   : > { %v374_v20 = vsel %vm369_vm2, %v368_v19, 0 }
 0x18f   : > { %1075 = vmatpush3.bf16.xpose.msra.mxu1 %v374_v20 }
 0x190   : > { %1086 = vmatprep.subr.bf16.mxu1 %v1422_v0 }
 0x191   : > { %v481_v21 = vpop.permute.xlu0 %480  ;;  %v592_v24 = vpop.permute.xlu1 %591 }
 0x192   : > { %v486_v23 = vsel %vm369_vm2, %v481_v21, 0  ;;  %v597_v25 = vsel %vm369_vm2, %v592_v24, 0 }
 0x195   : > { %v703_v26 = vpop.permute.xlu1 %702  ;;  %v590_v27 = vpop.permute.xlu0 %589 }
 0x196   : > { %1077 = vmatmul.mubr.msk.bf16.vlgmr.msra.gmra.mxu1 %vm369_vm2, %v1621_v16  ;;  %v708_v28 = vsel %vm369_vm2, %v703_v26, 0 }
 0x197   : > { %1087 = vmatpush3.bf16.xpose.msra.mxu1 %v486_v23  ;;  %1088 = vmatprep.mubr.msk.bf16.mxu1 %vm1423_vm0, %v1422_v0 }
 0x198   : > { %1098 = vmatprep.subr.bf16.mxu1 %v1422_v0 }
 0x199   : > { %v701_v29 = vpop.permute.xlu0 %700 }
 0x19e   : > { %1089 = vmatmul.mubr.msk.bf16.vlgmr.msra.gmra.mxu1 %vm369_vm2, %v479_v22 }
 0x19f   : > { %1099 = vmatpush3.bf16.xpose.msra.mxu1 %v597_v25  ;;  %1100 = vmatprep.mubr.msk.bf16.mxu1 %vm1423_vm0, %v1422_v0 }
 0x1a0   : > { %1110 = vmatprep.subr.bf16.mxu1 %v1422_v0 }
 0x1a6   : > { %1101 = vmatmul.mubr.msk.bf16.vlgmr.msra.gmra.mxu1 %vm369_vm2, %v590_v27 }
 0x1a7   : > { %1111 = vmatpush3.bf16.xpose.msra.mxu1 %v708_v28  ;;  %1112 = vmatprep.mubr.msk.bf16.mxu1 %vm1423_vm0, %v1422_v0 }
 0x1a8   : > { %1122 = vmatprep.subr.bf16.mxu1 %v1422_v0 }
 0x1ae   : > { %1113 = vmatmul.mubr.msk.bf16.vlgmr.msra.gmra.mxu1 %vm369_vm2, %v701_v29 }
 0x1af   : > { %1126 = vmatprep.mubr.msk.bf16.mxu1 %vm1423_vm0, %v1422_v0 }
 0x256   : > { %v410_v30 = vpop.f32.mrf.mxu1 }
 0x257   : > { %v416_v31 = vsel %vm369_vm2, %v410_v30, -inf }
 0x258   : > { %417 = vmax.xlane.f32.xlu1 %v416_v31  ;;  %v1078_v32 = vpop.f32.mrf.mxu1 }
 0x259   : > { %v1233_v32 = vld [vmem:[#allocation8 + $0x8] sm:$0xff]  }
 0x25a   : > { %v413_v33 = vpop.f32.mrf.mxu1  ;;  %1123 = vmatpush3.bf16.msra.mxu1 %v1233_v32 }
 0x25b   : > { %v1234_v33 = vld [vmem:[#allocation8] sm:$0xff]   ;;  %1124 = vmatprep.subr.bf16.mxu1 %v1422_v0 }
 0x25c   : > { %v1079_v34 = vpop.f32.mrf.mxu1 }
 0x25e   : > { %v522_v35 = vpop.f32.mrf.mxu1  ;;  %1125 = vmatpush3.bf16.msra.mxu1 %v1234_v33 }
 0x25f   : > { %v528_v36 = vsel %vm369_vm2, %v522_v35, -inf }
 0x260   : > { %529 = vmax.xlane.f32.xlu0 %v528_v36  ;;  %v1090_v37 = vpop.f32.mrf.mxu1 }
 0x262   : > { %v525_v38 = vpop.f32.mrf.mxu1 }
 0x264   : > { %v1091_v39 = vpop.f32.mrf.mxu1 }
 0x266   : > { %v633_v40 = vpop.f32.mrf.mxu1 }
 0x267   : > { %v639_v41 = vsel %vm369_vm2, %v633_v40, -inf }
 0x268   : > { %640 = vmax.xlane.f32.xlu0 %v639_v41  ;;  %v1102_v42 = vpop.f32.mrf.mxu1 }
 0x269   : > { %538 = vrot.lane.b32.xlu1 %v1621_v16, %s1431_s11  ;;  %s1331_s11 = scalar_lea.vmem %s912_s17, 128 }
 0x26a   : > { %v636_v43 = vpop.f32.mrf.mxu1  ;;  %p1332_p8 = scmp.ne.s32.totalorder %s912_s17, %s1331_s11 }
 0x26c   : > { %v1103_v44 = vpop.f32.mrf.mxu1  ;;  %p1333_p9 = pnand %p1332_p8, %p1564_p7 }
 0x26e   : > { %v744_v45 = vpop.f32.mrf.mxu1  ;;  %p1334_p11 = pneg %p1333_p9 }
 0x26f   : > { %v750_v49 = vsel %vm369_vm2, %v744_v45, -inf }
 0x270   : > { %v1114_v46 = vpop.f32.mrf.mxu1 }
 0x272   : > { %v747_v47 = vpop.f32.mrf.mxu1 }
 0x274   : > { %v1115_v48 = vpop.f32.mrf.mxu1 }
 0x27e   : > { %426 = vrot.lane.b32.xlu0 %v1621_v16, %s1432_s10  ;;  %s1438_s10 = smov [#allocation9]  }
 0x282   : > { %760 = vrot.lane.b32.xlu0 %v1621_v16, %s1433_s13  ;;  %s1335_s13 = sshll.u32 %s1438_s10, 4  ;;  %s1336_s13 = int_to_ptr.vmem [resolvable:$false] %s1335_s13 }
 0x283   : > { %s1337_s21 = scalar_lea.vmem %s1336_s13, 256  ;;  %p1338_p2 = scmp.lt.s32.totalorder %s912_s17, %s1336_s13 }
 0x284   : > { %p1339_p13 = scmp.lt.s32.totalorder %s1337_s21, %s1331_s11 }
 0x286   : > { %p1340_p0 = por %p1339_p13, %p1338_p2 }
 0x288   : > { %p1341_p5 = pnand %p1340_p0, %p1334_p11 }
 0x28d   : > { %751 = vmax.xlane.f32.xlu1 %v750_v49 }
 0x29e   : > { %649 = vrot.lane.b32.xlu1 %v1621_v16, %s1434_s14 }
 0x2e1   : > { %v418_v50 = vpop.xlane.xlu1 %417 }
 0x2e2   : > { %v419_v51 = vsub.f32 %v410_v30, %v418_v50 }
 0x2e4   : > { %v420_v52 = vmul.f32 1.442695, %v419_v51 }
 0x2e5   : > { %v539_v62 = vpop.permute.xlu1 %538 }
 0x2e6   : > { %1235 = vpow2.f32 %v420_v52  ;;  %v544_v1 = vsel %vm431_vm3, %v539_v62, 0 }
 0x2e9   : > { %v530_v53 = vpop.xlane.xlu0 %529 }
 0x2ea   : > { %v531_v54 = vsub.f32 %v522_v35, %v530_v53 }
 0x2ec   : > { %v532_v55 = vmul.f32 1.442695, %v531_v54 }
 0x2ee   : > { %1237 = vpow2.f32 %v532_v55 }
 0x2f1   : > { %v641_v56 = vpop.xlane.xlu0 %640 }
 0x2f2   : > { %v642_v57 = vsub.f32 %v633_v40, %v641_v56 }
 0x2f3   : > { %v1236_v59 = vpop.eup %1235 }
 0x2f4   : > { %v643_v58 = vmul.f32 1.442695, %v642_v57  ;;  %v425_v63 = vpack.c.bf16 %v1236_v59, %v1236_v59  ;;  %v422_v4 = vsel %vm369_vm2, %v1236_v59, 0.0 }
 0x2f5   : > { %v427_v60 = vpop.permute.xlu0 %426 }
 0x2f6   : > { %1239 = vpow2.f32 %v643_v58  ;;  %v433_v61 = vsel %vm431_vm3, %v427_v60, 0  ;;  %v829_v58 = vld [vmem:[#allocation2] sm:$0xff] }
 0x2f7   : > { %1081 = vmatpush3.bf16.msra.mxu0 %v433_v61 }
 0x2f8   : > { %1092 = vmatprep.subr.bf16.mxu0 %v1422_v0 }
 0x2f9   : > { %v761_v13 = vpop.permute.xlu0 %760 }
 0x2fa   : > { %1083 = vmatmul.mubr.msk.bf16.vlgmr.msra.gmra.mxu0 %vm369_vm2, %v425_v63  ;;  %v766_v15 = vsel %vm431_vm3, %v761_v13, 0 }
 0x2fb   : > { %v1238_v2 = vpop.eup %1237  ;;  %1093 = vmatpush3.bf16.msra.mxu0 %v544_v1  ;;  %1094 = vmatprep.mubr.msk.bf16.mxu0 %vm1423_vm0, %v1422_v0 }
 0x2fc   : > { %v534_v3 = vsel %vm369_vm2, %v1238_v2, 0.0  ;;  %1104 = vmatprep.subr.bf16.mxu0 %v1422_v0  ;;  %v537_v5 = vpack.c.bf16 %v1238_v2, %v1238_v2 }
 0x2fd   : > { %535 = vadd.xlane.f32.xlu1 %v534_v3 }
 0x301   : > { %423 = vadd.xlane.f32.xlu1 %v422_v4 }
 0x302   : > { %1095 = vmatmul.mubr.msk.bf16.vlgmr.msra.gmra.mxu0 %vm369_vm2, %v537_v5 }
 0x303   : > { %v1240_v6 = vpop.eup %1239  ;;  %1106 = vmatprep.mubr.msk.bf16.mxu0 %vm1423_vm0, %v1422_v0 }
 0x304   : > { %v645_v7 = vsel %vm369_vm2, %v1240_v6, 0.0  ;;  %v648_v14 = vpack.c.bf16 %v1240_v6, %v1240_v6 }
 0x305   : > { %646 = vadd.xlane.f32.xlu0 %v645_v7 }
 0x316   : > { %v752_v8 = vpop.xlane.xlu1 %751 }
 0x317   : > { %v753_v9 = vsub.f32 %v744_v45, %v752_v8 }
 0x319   : > { %v754_v10 = vmul.f32 1.442695, %v753_v9 }
 0x31a   : > { %v650_v11 = vpop.permute.xlu1 %649 }
 0x31b   : > { %1241 = vpow2.f32 %v754_v10  ;;  %v655_v12 = vsel %vm431_vm3, %v650_v11, 0 }
 0x31c   : > { %1105 = vmatpush3.bf16.msra.mxu0 %v655_v12 }
 0x31d   : > { %1116 = vmatprep.subr.bf16.mxu0 %v1422_v0 }
 0x31f   : > { %1107 = vmatmul.mubr.msk.bf16.vlgmr.msra.gmra.mxu0 %vm369_vm2, %v648_v14 }
 0x320   : > { %1117 = vmatpush3.bf16.msra.mxu0 %v766_v15  ;;  %1118 = vmatprep.mubr.msk.bf16.mxu0 %vm1423_vm0, %v1422_v0 }
 0x328   : > { %v1242_v16 = vpop.eup %1241 }
 0x329   : > { %v756_v17 = vsel %vm369_vm2, %v1242_v16, 0.0  ;;  %v759_v18 = vpack.c.bf16 %v1242_v16, %v1242_v16 }
 0x32a   : > { %757 = vadd.xlane.f32.xlu0 %v756_v17 }
 0x32b   : > { %1119 = vmatmul.mubr.msk.bf16.vlgmr.msra.gmra.mxu0 %vm369_vm2, %v759_v18 }
 0x386   : > { %v536_v19 = vpop.xlane.xlu1 %535 }
 0x387   : > { %1243 = vrcp.f32 %v536_v19 }
 0x38a   : > { %v424_v48 = vpop.xlane.xlu1 %423 }
 0x38e   : > { %v647_v31 = vpop.xlane.xlu0 %646 }
 0x38f   : > { %1245 = vrcp.f32 %v647_v31 }
 0x394   : > { %v1244_v24 = vpop.eup %1243 }
 0x39c   : > { %v1246_v35 = vpop.eup %1245 }
 0x3b3   : > { %v758_v34 = vpop.xlane.xlu0 %757 }
 0x3b4   : > { %1247 = vrcp.f32 %v758_v34 }
 0x3b5   : > { %1249 = vrcp.f32 %v424_v48 }
 0x3ba   : > { %v469_v20 = vpop.f32.mrf.mxu0 }
 0x3bc   : > { %v1084_v21 = vpop.f32.mrf.mxu0 }
 0x3be   : > { %v472_v22 = vpop.f32.mrf.mxu0 }
 0x3c0   : > { %v1085_v23 = vpop.f32.mrf.mxu0 }
 0x3c1   : > { %v1248_v42 = vpop.eup %1247 }
 0x3c2   : > { %v580_v25 = vpop.f32.mrf.mxu0  ;;  %v1250_v49 = vpop.eup %1249 }
 0x3c3   : > { %v587_v26 = vmul.f32 %v1244_v24, %v580_v25  ;;  %v476_v50 = vmul.f32 %v1250_v49, %v469_v20 }
 0x3c4   : > { %v1096_v27 = vpop.f32.mrf.mxu0 }
 0x3c5   : > { %v588_v28 = vpack.c.bf16 %v587_v26, %v587_v26  ;;  %v477_v53 = vpack.c.bf16 %v476_v50, %v476_v50 }
 0x3c6   : > { %v583_v29 = vpop.f32.mrf.mxu0 }
 0x3c7   : > { %812 = vrot.lane.b32.xlu0 %v588_v28, %s1435_s1 }
 0x3c8   : > { %v1097_v30 = vpop.f32.mrf.mxu0 }
 0x3df   : > { %v691_v36 = vpop.f32.mrf.mxu0 }
 0x3e0   : > { %v698_v37 = vmul.f32 %v1246_v35, %v691_v36 }
 0x3e1   : > { %v1108_v38 = vpop.f32.mrf.mxu0 }
 0x3e2   : > { %v699_v39 = vpack.c.bf16 %v698_v37, %v698_v37 }
 0x3e3   : > { %v694_v40 = vpop.f32.mrf.mxu0 }
 0x3e4   : > { %815 = vrot.lane.b32.xlu1 %v699_v39, %s1436_s26 }
 0x3e5   : > { %v1109_v41 = vpop.f32.mrf.mxu0 }
 0x3eb   : > { %v802_v43 = vpop.f32.mrf.mxu0 }
 0x3ec   : > { %v809_v44 = vmul.f32 %v1248_v42, %v802_v43 }
 0x3ed   : > { %v1120_v45 = vpop.f32.mrf.mxu0 }
 0x3ee   : > { %v810_v46 = vpack.c.bf16 %v809_v44, %v809_v44 }
 0x3ef   : > { %v805_v47 = vpop.f32.mrf.mxu0 }
 0x3f0   : > { %818 = vrot.lane.b32.xlu1 %v810_v46, %s1437_s28 }
 0x3f1   : > { %v1121_v0 = vpop.f32.mrf.mxu0 }
 0x439   : > { %v813_v51 = vpop.permute.xlu0 %812 }
 0x43a   : > { %v822_v54 = vsel %vm369_vm2, %v477_v53, %v813_v51 }
 0x456   : > { %v816_v52 = vpop.permute.xlu1 %815 }
 0x457   : > { %v825_v55 = vsel %vm823_vm4, %v822_v54, %v816_v52 }
 0x462   : > { %v819_v56 = vpop.permute.xlu1 %818 }
 0x463   : > { %v828_v57 = vsel %vm826_vm5, %v825_v55, %v819_v56 }
 0x464   : > { %1127 = vmatmul.mubr.msk.bf16.vlgmr.msra.gmra.mxu1 %vm292_vm1, %v828_v57 }
 0x524   : > { %v884_v59 = vpop.f32.mrf.mxu1 }
 0x525   : > { %v890_v60 = vadd.f32 %v884_v59, %v829_v58 }
 0x526   : > { %v1128_v61 = vpop.f32.mrf.mxu1 }
 0x527   : > { %891 = vst.msk [vmem:[#allocation2] sm:$0xff] %vm292_vm1, %v890_v60 }
 0x528   : > { %v887_v62 = vpop.f32.mrf.mxu1 }
 0x52a   : > { %v1129_v63 = vpop.f32.mrf.mxu1 }
 0x52e   : > { %v895_v1 = vld [vmem:[#allocation2] sm:$0xff] }
 0x52f   : > { %896 = vst.msk [vmem:[%s280_s16] sm:$0xff] %vm292_vm1, %v895_v1 }
 0x530   : > { %1344 = shalt.err (!%p1341_p5)
}
 0x531   : > { %s1345_s14 = scalar_lea.hbm %s1689_s8, 128  ;;  %s1349_s26 = scalar_lea.hbm %s1737_s5, 256 }
 0x532   : > { %p1346_p10 = scmp.ne.s32.totalorder %s1689_s8, %s1345_s14  ;;  %p1350_p6 = scmp.lt.s32.totalorder %s1689_s8, %s1737_s5 }
 0x533   : > { %p1351_p12 = scmp.lt.s32.totalorder %s1349_s26, %s1345_s14 }
 0x534   : > { %p1347_p1 = pnand %p1346_p10, %p1564_p7 }
 0x535   : > { %p1352_p3 = por %p1351_p12, %p1350_p6 }
 0x536   : > { %p1348_p4 = pneg %p1347_p1 }
 0x538   : > { %p1353_p8 = pnand %p1352_p3, %p1348_p4 }
 0x53a   : > { %1356 = shalt.err (!%p1353_p8)
}
 0x53b   : > { %1140 = dma.vmem_to_hbm [thread:$0]  (%p1564_p7), %s912_s17, 128, %s1689_s8, %s898_s6  }
 0x53c PF: > { %s923_s15 = sand.u32 1, %s1395_s18   ;;  %p1753_p9 = scmp.ne.s32.totalorder %s1745_s29, 0 }
 0x53d   : > { %p1754_p11 = scmp.ge.s32.totalorder %s1415_s23, 2  ;;  %s924_s16 = scalar_lea.sflag [#allocation5], %s923_s15 }
 0x53f   : > { %p1154_p2 = pnand %p1754_p11, %p1753_p9 }
 0x541   : > { %p1155_p13 = pneg %p1154_p2 }
 0x543   : > { %1390 = dma.done.wait (%p1155_p13), %s924_s16, 128  }
 0x544   : > { %1392 = vsyncadd (%p1155_p13), %s924_s16, 4294967168  ;;  %s22_s23 = sadd.s32 1, %s1415_s23   ;;  %s1755_s18 = smov %s1399_s19 }
 0x545   : > { %p19_p0 = scmp.ge.s32.totalorder %s22_s23, 4   ;;  %s1756_s19 = smov %s1403_s20 }
 0x546   : > { %s1757_s20 = smov %s1573_s12  ;;  %s1758_s21 = smov %s1411_s22 }
 0x547   : > { %s1759_s22 = smov %s1761_s25  ;;  %21 = sbr.rel (!%p19_p0) target bundleno = 9 (0x9), region = 104 }
 0x54c   :  { %929 = vsyncpa [#allocation4], 1 }
 0x54d   :  { %931 = vsyncpa [#allocation4 + $0x1], 1 }
 0x54e   :  { %932 = vsyncpa [#allocation7], 1 }
 0x54f   :  { %933 = vsyncpa [#allocation5], 1 }
 0x550   :  { %935 = vsyncpa [#allocation5 + $0x1], 1 }

</bundles_post_ra>
